<compile_context>
chip_gen: v7x
topology: tpu7x:2x2x1
jax: 0.10.0
libtpu: 0.0.40
codegen_flags: <defaults>
</compile_context>

<pallas_src>
import functools

import jax
import jax.numpy as jnp
from jax.experimental import pallas as pl
from jax.experimental.pallas import tpu as pltpu

BN_EPS = 1e-5
LANE = 128
MAX_TILE = 2048   # rows per grid step upper bound (VMEM stays ~11 MB w/ dbl-buffer)


def _round_up(n, m):
    return ((n + m - 1) // m) * m


def _age_classifier_kernel(
    x_ref,          # (TB, 512)            f32 (cast to bf16 in-kernel)
    w_cat_ref,      # (512, NA_PAD + 256)  bf16  = [W_age_pad | W1]
    b_cat_ref,      # (1,   NA_PAD + 256)  f32   = [b_age_pad | b1]
    w2_ref,         # (256, NG_PAD)        f32   (BN folded in)
    b2_ref,         # (1,   NG_PAD)        f32   (BN folded in)
    age_out_ref,    # (TB, NA_PAD)         bf16
    group_out_ref,  # (TB, NG_PAD)         bf16
    *,
    na_pad,
):
    # Cast activation to the MXU compute dtype in-kernel (no extra HBM pass).
    x = x_ref[...].astype(w_cat_ref.dtype)

    # One wide MXU pass over the shared input: [age head | hidden] in a single dot.
    y = (
        jnp.dot(x, w_cat_ref[...], preferred_element_type=jnp.float32)
        + b_cat_ref[...]
    )

    # Head 1: age logits (lane-dense, padded columns sliced off in the wrapper).
    age_out_ref[...] = y[:, :na_pad].astype(age_out_ref.dtype)

    # Head 2: ReLU -> (BatchNorm folded into w2/b2) -> Dropout(identity) -> Linear.
    h = jnp.maximum(y[:, na_pad:], 0.0)
    group_out_ref[...] = (
        jnp.dot(h, w2_ref[...], preferred_element_type=jnp.float32) + b2_ref[...]
    ).astype(group_out_ref.dtype)


def fold_and_pad_params(params, compute_dtype=jnp.bfloat16):
    """One-time host-side prep: fold eval-mode BN into the second Linear and
    pad / concatenate weights into lane-dense (multiple-of-128) slabs."""
    num_ages = params["w_age"].shape[1]
    num_age_groups = params["w2"].shape[1]
    na_pad = _round_up(num_ages, LANE)
    ng_pad = _round_up(num_age_groups, LANE)

    # Fold BN:  out = ((relu(h) - mean) * s + beta) @ W2 + b2,  s = gamma*rsqrt(var+eps)
    #        =>  relu(h) @ (s_col * W2) + ((beta - mean*s) @ W2 + b2)
    s = params["gamma"] * jax.lax.rsqrt(params["running_var"] + BN_EPS)  # (1, 256)
    w2_f = params["w2"] * s.reshape(-1, 1)                               # (256, G)
    b2_f = (params["beta"] - params["running_mean"] * s) @ params["w2"] + params["b2"]

    # Zero-pad ragged output dims to 128 lanes.
    w_age_p = jnp.pad(params["w_age"], ((0, 0), (0, na_pad - num_ages)))
    b_age_p = jnp.pad(params["b_age"], ((0, 0), (0, na_pad - num_ages)))
    w2_p = jnp.pad(w2_f, ((0, 0), (0, ng_pad - num_age_groups)))
    b2_p = jnp.pad(b2_f, ((0, 0), (0, ng_pad - num_age_groups)))

    # Concatenate both K=512 heads into one weight / bias slab.
    w_cat = jnp.concatenate([w_age_p, params["w1"]], axis=1)   # (512, na_pad+256)
    b_cat = jnp.concatenate([b_age_p, params["b1"]], axis=1)   # (1,   na_pad+256)

    return {
        "w_cat": w_cat.astype(compute_dtype),
        "b_cat": b_cat.astype(jnp.float32),
        "w2": w2_p.astype(jnp.float32),     # tiny head kept f32 (accuracy, no perf cost)
        "b2": b2_p.astype(jnp.float32),
        "num_ages": num_ages,
        "num_age_groups": num_age_groups,
        "na_pad": na_pad,
        "ng_pad": ng_pad,
        "compute_dtype": compute_dtype,
    }


def _pick_batch_tile(B):
    """Batch tile: multiple of 16 sublanes (bf16 vreg packing), >=2 grid steps for
    mid/large B (so v7x's two TensorCores both get work), sized to minimize
    last-tile waste and capped at MAX_TILE rows."""
    if B <= 256:
        return _round_up(B, 16)
    n_tiles = max(2, pl.cdiv(B, MAX_TILE))
    return _round_up(pl.cdiv(B, n_tiles), 16)


def age_classifier_forward(x, kp, slice_outputs=True):
    """x: (B, 512) float32.  kp: output of fold_and_pad_params.

    Returns bf16 logits. With slice_outputs=False the padded (B, 128) slabs are
    returned directly (cheaper if downstream only argmaxes the first N columns).
    """
    B = x.shape[0]
    na_pad, ng_pad = kp["na_pad"], kp["ng_pad"]
    n_cat = kp["w_cat"].shape[1]

    tb = _pick_batch_tile(B)
    grid = (pl.cdiv(B, tb),)   # ragged last block handled by Pallas, no HBM pad copy

    vmem = pltpu.MemorySpace.VMEM
    in_specs = [
        pl.BlockSpec((tb, 512), lambda i: (i, 0), memory_space=vmem),      # x (f32)
        pl.BlockSpec((512, n_cat), lambda i: (0, 0), memory_space=vmem),   # w_cat (resident)
        pl.BlockSpec((1, n_cat), lambda i: (0, 0), memory_space=vmem),     # b_cat (resident)
        pl.BlockSpec((256, ng_pad), lambda i: (0, 0), memory_space=vmem),  # w2    (resident)
        pl.BlockSpec((1, ng_pad), lambda i: (0, 0), memory_space=vmem),    # b2    (resident)
    ]
    out_specs = (
        pl.BlockSpec((tb, na_pad), lambda i: (i, 0), memory_space=vmem),
        pl.BlockSpec((tb, ng_pad), lambda i: (i, 0), memory_space=vmem),
    )

    # Advisory cost hint for the XLA scheduler around the custom call.
    flops = 2 * B * 512 * n_cat + 2 * B * 256 * ng_pad
    bytes_accessed = (
        B * 512 * 4                        # x read (f32)
        + B * (na_pad + ng_pad) * 2        # bf16 outputs
        + kp["w_cat"].size * 2 + kp["b_cat"].size * 4
        + kp["w2"].size * 4 + kp["b2"].size * 4
    )

    age_p, group_p = pl.pallas_call(
        functools.partial(_age_classifier_kernel, na_pad=na_pad),
        out_shape=(
            jax.ShapeDtypeStruct((B, na_pad), jnp.bfloat16),
            jax.ShapeDtypeStruct((B, ng_pad), jnp.bfloat16),
        ),
        grid=grid,
        in_specs=in_specs,
        out_specs=out_specs,
        compiler_params=pltpu.CompilerParams(
            dimension_semantics=("parallel",),
        ),
        cost_estimate=pl.CostEstimate(
            flops=flops, transcendentals=0, bytes_accessed=bytes_accessed
        ),
    )(x, kp["w_cat"], kp["b_cat"], kp["w2"], kp["b2"])

    if not slice_outputs:
        return age_p, group_p
    # Batch dim is already exact (no batch padding); only strip lane padding.
    return age_p[:, : kp["num_ages"]], group_p[:, : kp["num_age_groups"]]


def init_params(key, num_ages, num_age_groups):
    """Deterministic synthetic parameters matching the PyTorch module shapes.

    Linear weights are stored as (in, out) = transposed nn.Linear weight.
    """
    ks = jax.random.split(key, 10)
    scale = 0.02
    return {
        "w_age": scale * jax.random.normal(ks[0], (512, num_ages), jnp.float32),
        "b_age": scale * jax.random.normal(ks[1], (1, num_ages), jnp.float32),
        "w1": scale * jax.random.normal(ks[2], (512, 256), jnp.float32),
        "b1": scale * jax.random.normal(ks[3], (1, 256), jnp.float32),
        # BatchNorm1d(256) parameters / running stats (eval mode).
        "gamma": 1.0 + 0.1 * jax.random.normal(ks[4], (1, 256), jnp.float32),
        "beta": 0.1 * jax.random.normal(ks[5], (1, 256), jnp.float32),
        "running_mean": 0.1 * jax.random.normal(ks[6], (1, 256), jnp.float32),
        "running_var": jnp.abs(
            1.0 + 0.1 * jax.random.normal(ks[7], (1, 256), jnp.float32)
        ),
        "w2": scale * jax.random.normal(ks[8], (256, num_age_groups), jnp.float32),
        "b2": scale * jax.random.normal(ks[9], (1, num_age_groups), jnp.float32),
    }


def reference_forward(x, p):
    """Pure-JAX f32 reference (unfused, unfolded) for correctness checking."""
    age = x @ p["w_age"] + p["b_age"]
    h = jnp.maximum(x @ p["w1"] + p["b1"], 0.0)
    h = (h - p["running_mean"]) * jax.lax.rsqrt(p["running_var"] + BN_EPS) \
        * p["gamma"] + p["beta"]
    group = h @ p["w2"] + p["b2"]
    return age, group


if __name__ == "__main__":
    key = jax.random.PRNGKey(0)
    k_x, k_p = jax.random.split(key)

    B = 8
    NUM_AGES = 100
    NUM_AGE_GROUPS = 10

    x = jax.random.normal(k_x, (B, 512), jnp.float32)
    params = init_params(k_p, NUM_AGES, NUM_AGE_GROUPS)
    kernel_params = fold_and_pad_params(params, compute_dtype=jnp.bfloat16)

    age_pred, age_group_pred = age_classifier_forward(x, kernel_params)
    age_pred = jax.block_until_ready(age_pred)
    age_group_pred = jax.block_until_ready(age_group_pred)

    # Sanity check against pure-JAX f32 reference (bf16 weights/activations/outputs
    # with f32 accumulation -> loosened tolerance vs the f32 reference).
    age_ref, group_ref = reference_forward(x, params)
    assert age_pred.shape == (B, NUM_AGES)
    assert age_group_pred.shape == (B, NUM_AGE_GROUPS)
    assert jnp.allclose(age_pred.astype(jnp.float32), age_ref, atol=3e-2, rtol=3e-2)
    assert jnp.allclose(age_group_pred.astype(jnp.float32), group_ref,
                        atol=3e-2, rtol=3e-2)

    print("KERNEL_OK")
</pallas_src>

<mosaic_0001>
module attributes {stable_mosaic.version = 11 : i64} {
  func.func @_age_classifier_kernel(%arg0: i32, %arg1: memref<16x512xf32, #tpu.memory_space<vmem>>, %arg2: memref<512x384xbf16, #tpu.memory_space<vmem>>, %arg3: memref<1x384xf32, #tpu.memory_space<vmem>>, %arg4: memref<256x128xf32, #tpu.memory_space<vmem>>, %arg5: memref<1x128xf32, #tpu.memory_space<vmem>>, %arg6: memref<16x128xbf16, #tpu.memory_space<vmem>>, %arg7: memref<16x128xbf16, #tpu.memory_space<vmem>>) attributes {dimension_semantics = [#tpu.dimension_semantics<parallel>], iteration_bounds = array<i64: 1>, scalar_prefetch = 0 : i64, scratch_operands = 0 : i64, tpu.core_type = #tpu.core_type<tc>, window_params = [{transform_indices = @transform_0, window_bounds = array<i64: 16, 512>}, {pipeline_mode = #tpu.pipeline_mode<synchronous>, transform_indices = @transform_1, window_bounds = array<i64: 512, 384>}, {pipeline_mode = #tpu.pipeline_mode<synchronous>, transform_indices = @transform_2, window_bounds = array<i64: 1, 384>}, {pipeline_mode = #tpu.pipeline_mode<synchronous>, transform_indices = @transform_3, window_bounds = array<i64: 256, 128>}, {pipeline_mode = #tpu.pipeline_mode<synchronous>, transform_indices = @transform_4, window_bounds = array<i64: 1, 128>}, {transform_indices = @transform_5, window_bounds = array<i64: 16, 128>}, {transform_indices = @transform_6, window_bounds = array<i64: 16, 128>}]} {
    %c0 = arith.constant 0 : index
    %c0_0 = arith.constant 0 : index
    %0 = vector.load %arg1[%c0, %c0_0] : memref<16x512xf32, #tpu.memory_space<vmem>>, vector<16x512xf32>
    %1 = arith.truncf %0 : vector<16x512xf32> to vector<16x512xbf16>
    %c0_1 = arith.constant 0 : index
    %c0_2 = arith.constant 0 : index
    %2 = vector.load %arg2[%c0_1, %c0_2] : memref<512x384xbf16, #tpu.memory_space<vmem>>, vector<512x384xbf16>
    %cst = arith.constant dense<0.000000e+00> : vector<16x384xf32>
    %3 = tpu.matmul %1, %2, %cst {dimension_numbers = #tpu.dot_dimension_numbers<[1], [0], [0], [1], [0, 0, 1, 1], [], []>} : vector<16x512xbf16>, vector<512x384xbf16>, vector<16x384xf32> -> vector<16x384xf32>
    %c0_3 = arith.constant 0 : index
    %c0_4 = arith.constant 0 : index
    %4 = vector.load %arg3[%c0_3, %c0_4] : memref<1x384xf32, #tpu.memory_space<vmem>>, vector<1x384xf32>
    %5 = vector.broadcast %4 : vector<1x384xf32> to vector<16x384xf32>
    %6 = arith.addf %3, %5 : vector<16x384xf32>
    %7 = vector.extract_strided_slice %6 {offsets = [0, 0], sizes = [16, 128], strides = [1, 1]} : vector<16x384xf32> to vector<16x128xf32>
    %8 = arith.truncf %7 : vector<16x128xf32> to vector<16x128xbf16>
    %c0_5 = arith.constant 0 : index
    %c0_6 = arith.constant 0 : index
    %9 = vector.load %arg6[%c0_5, %c0_6] : memref<16x128xbf16, #tpu.memory_space<vmem>>, vector<16x128xbf16>
    tpu.vector_store %arg6[%c0_5, %c0_6], %8 {strides = array<i32>} : memref<16x128xbf16, #tpu.memory_space<vmem>>, vector<16x128xbf16>,
    %10 = vector.extract_strided_slice %6 {offsets = [0, 128], sizes = [16, 256], strides = [1, 1]} : vector<16x384xf32> to vector<16x256xf32>
    %cst_7 = arith.constant 0.000000e+00 : f32
    %11 = vector.broadcast %cst_7 : f32 to vector<16x256xf32>
    %12 = arith.maximumf %10, %11 : vector<16x256xf32>
    %c0_8 = arith.constant 0 : index
    %c0_9 = arith.constant 0 : index
    %13 = vector.load %arg4[%c0_8, %c0_9] : memref<256x128xf32, #tpu.memory_space<vmem>>, vector<256x128xf32>
    %cst_10 = arith.constant dense<0.000000e+00> : vector<16x128xf32>
    %14 = tpu.matmul %12, %13, %cst_10 {dimension_numbers = #tpu.dot_dimension_numbers<[1], [0], [0], [1], [0, 0, 1, 1], [], []>} : vector<16x256xf32>, vector<256x128xf32>, vector<16x128xf32> -> vector<16x128xf32>
    %c0_11 = arith.constant 0 : index
    %c0_12 = arith.constant 0 : index
    %15 = vector.load %arg5[%c0_11, %c0_12] : memref<1x128xf32, #tpu.memory_space<vmem>>, vector<1x128xf32>
    %16 = vector.broadcast %15 : vector<1x128xf32> to vector<16x128xf32>
    %17 = arith.addf %14, %16 : vector<16x128xf32>
    %18 = arith.truncf %17 : vector<16x128xf32> to vector<16x128xbf16>
    %c0_13 = arith.constant 0 : index
    %c0_14 = arith.constant 0 : index
    %19 = vector.load %arg7[%c0_13, %c0_14] : memref<16x128xbf16, #tpu.memory_space<vmem>>, vector<16x128xbf16>
    tpu.vector_store %arg7[%c0_13, %c0_14], %18 {strides = array<i32>} : memref<16x128xbf16, #tpu.memory_space<vmem>>, vector<16x128xbf16>,
    return
  }
  func.func @transform_0(%arg0: i32) -> (i32, i32) {
    %c0_i32 = arith.constant 0 : i32
    %c0_i32_0 = arith.constant 0 : i32
    return %arg0, %c0_i32 : i32, i32
  }
  func.func @transform_1(%arg0: i32) -> (i32, i32) {
    %c0_i32 = arith.constant 0 : i32
    %c0_i32_0 = arith.constant 0 : i32
    %c0_i32_1 = arith.constant 0 : i32
    return %c0_i32, %c0_i32_0 : i32, i32
  }
  func.func @transform_2(%arg0: i32) -> (i32, i32) {
    %c0_i32 = arith.constant 0 : i32
    %c0_i32_0 = arith.constant 0 : i32
    %c0_i32_1 = arith.constant 0 : i32
    return %c0_i32, %c0_i32_0 : i32, i32
  }
  func.func @transform_3(%arg0: i32) -> (i32, i32) {
    %c0_i32 = arith.constant 0 : i32
    %c0_i32_0 = arith.constant 0 : i32
    %c0_i32_1 = arith.constant 0 : i32
    return %c0_i32, %c0_i32_0 : i32, i32
  }
  func.func @transform_4(%arg0: i32) -> (i32, i32) {
    %c0_i32 = arith.constant 0 : i32
    %c0_i32_0 = arith.constant 0 : i32
    %c0_i32_1 = arith.constant 0 : i32
    return %c0_i32, %c0_i32_0 : i32, i32
  }
  func.func @transform_5(%arg0: i32) -> (i32, i32) {
    %c0_i32 = arith.constant 0 : i32
    %c0_i32_0 = arith.constant 0 : i32
    return %arg0, %c0_i32 : i32, i32
  }
  func.func @transform_6(%arg0: i32) -> (i32, i32) {
    %c0_i32 = arith.constant 0 : i32
    %c0_i32_0 = arith.constant 0 : i32
    return %arg0, %c0_i32 : i32, i32
  }
}

</mosaic_0001>

<bundles_post_ra>
// kernel: tpu_custom_call.1
= control target key start
LH: loop header
LB: loop body
LE: loop exit
PB: predicated region body
PF: predicated region fallthrough
CT: control target
= control target key end

     0   :  { %12 = vsyncpa [#allocation3], 0  ;;  %s1685_s0 = inlined_call_operand.hbm [shape: f32[8,512], index: 0, kind: input, shape index: {}]   ;;  %s1686_s1 = inlined_call_operand.hbm [shape: bf16[512,384], index: 1, kind: input, shape index: {}]   ;;  %s1687_s2 = inlined_call_operand.vmem [shape: f32[1,384], index: 2, kind: input, shape index: {}]   ;;  %s1688_s3 = inlined_call_operand.hbm [shape: f32[256,128], index: 3, kind: input, shape index: {}]   ;;  %s1689_s4 = inlined_call_operand.vmem [shape: f32[1,128], index: 4, kind: input, shape index: {}]   ;;  %s1690_s5 = inlined_call_operand.hbm [shape: bf16[8,128], index: 5, kind: output, shape index: {0}]   ;;  %s1691_s6 = inlined_call_operand.hbm [shape: bf16[8,128], index: 6, kind: output, shape index: {1}]  }
   0x1   :  { %13 = vsyncpa [#allocation6], 0 }
   0x2   :  { %14 = vsyncpa [#allocation4], 0 }
   0x3   :  { %15 = vsyncpa [#allocation10], 0 }
   0x4   :  { %20 = vsyncadd [#allocation3], 512  ;;  %s1571_s21 = smov [#allocation5]   ;;  %s1453_s25 = scalar_lea.hbm %s1686_s1, 12288 }
   0x5   :  { %s33_s22 = sshll.u32 %s1571_s21, 4  ;;  %p1454_p0 = scmp.ne.s32.totalorder %s1686_s1, %s1453_s25  ;;  %s34_s22 = int_to_ptr.vmem [resolvable:$true] %s33_s22 }
   0x6   :  { %p1457_p1 = scmp.lt.u32.totalorder %s1453_s25, %s1686_s1 }
   0x8   :  { %p1459_p2 = pnand %p1457_p1, %p1454_p0 }
   0xa   :  { %1462 = shalt.err (!%p1459_p2)
}
   0xb   :  { %s1463_s30 = scalar_lea.vmem %s34_s22, 12288  ;;  %p1468_p4 = scmp.lt.s32.totalorder %s34_s22, %s34_s22 }
   0xc   :  { %p1464_p3 = scmp.ne.s32.totalorder %s34_s22, %s1463_s30  ;;  %p1469_p5 = scmp.lt.s32.totalorder %s1463_s30, %s1463_s30 }
   0xe   :  { %p1470_p6 = por %p1469_p5, %p1468_p4 }
  0x10   :  { %p1471_p7 = pnand %p1470_p6, %p1464_p3 }
  0x12   :  { %1474 = shalt.err (!%p1471_p7)
}
  0x13   :  { %s1572_s7 = smov 192   ;;  %s1573_s8 = smov 12  }
  0x14   :  { %39 = dma.hbm_to_vmem [thread:$0]  %s1686_s1, 12288, %s34_s22, [#allocation6], %s1572_s7, %s1572_s7, %s1573_s8  }
  0x15   :  { %s1574_s11 = smov [#allocation2]   ;;  %s1475_s15 = scalar_lea.hbm %s1685_s0, 512 }
  0x16   :  { %s21_s12 = sshll.u32 %s1574_s11, 4  ;;  %p1476_p8 = scmp.ne.s32.totalorder %s1685_s0, %s1475_s15  ;;  %s22_s12 = int_to_ptr.vmem [resolvable:$true] %s21_s12 }
  0x17   :  { %p1479_p9 = scmp.lt.u32.totalorder %s1475_s15, %s1685_s0 }
  0x19   :  { %p1481_p10 = pnand %p1479_p9, %p1476_p8 }
  0x1b   :  { %1484 = shalt.err (!%p1481_p10)
}
  0x1c   :  { %s1485_s20 = scalar_lea.vmem %s22_s12, 512  ;;  %s1489_s1 = scalar_lea.vmem %s22_s12, 1024 }
  0x1d   :  { %p1486_p11 = scmp.ne.s32.totalorder %s22_s12, %s1485_s20  ;;  %p1490_p12 = scmp.lt.s32.totalorder %s22_s12, %s22_s12 }
  0x1e   :  { %p1491_p13 = scmp.lt.s32.totalorder %s1489_s1, %s1485_s20 }
  0x20   :  { %p1492_p0 = por %p1491_p13, %p1490_p12 }
  0x22   :  { %p1493_p1 = pnand %p1492_p0, %p1486_p11 }
  0x24   :  { %1496 = shalt.err (!%p1493_p1)
}
  0x25   :  { %s1575_s21 = smov 512   ;;  %s1576_s22 = smov 32  }
  0x26   :  { %27 = dma.hbm_to_vmem [thread:$0]  %s1685_s0, 512, %s22_s12, [#allocation3], %s1575_s21, %s1575_s21, %s1576_s22  }
  0x27   :  { %s1577_s25 = smov [#allocation7]   ;;  %s1497_s29 = scalar_lea.hbm %s1688_s3, 4096 }
  0x28   :  { %s47_s26 = sshll.u32 %s1577_s25, 4  ;;  %p1498_p2 = scmp.ne.s32.totalorder %s1688_s3, %s1497_s29  ;;  %s48_s26 = int_to_ptr.vmem [resolvable:$true] %s47_s26 }
  0x29   :  { %p1501_p3 = scmp.lt.u32.totalorder %s1497_s29, %s1688_s3 }
  0x2b   :  { %p1503_p4 = pnand %p1501_p3, %p1498_p2 }
  0x2d   :  { %1506 = shalt.err (!%p1503_p4)
}
  0x2e   :  { %s1507_s10 = scalar_lea.vmem %s48_s26, 4096  ;;  %p1512_p6 = scmp.lt.s32.totalorder %s48_s26, %s48_s26 }
  0x2f   :  { %p1508_p5 = scmp.ne.s32.totalorder %s48_s26, %s1507_s10  ;;  %p1513_p7 = scmp.lt.s32.totalorder %s1507_s10, %s1507_s10 }
  0x31   :  { %p1514_p8 = por %p1513_p7, %p1512_p6 }
  0x33   :  { %p1515_p9 = pnand %p1514_p8, %p1508_p5 }
  0x35   :  { %1518 = shalt.err (!%p1515_p9)
}
  0x36   :  { %s1578_s0 = smov 128   ;;  %s1579_s11 = smov 8  }
  0x37   :  { %53 = dma.hbm_to_vmem [thread:$0]  %s1688_s3, 4096, %s48_s26, [#allocation6], %s1578_s0, %s1578_s0, %s1579_s11  }
  0x38   :  { %1563 = dma.done.wait [#allocation3], 1024  }
  0x39   :  { %1564 = vsyncadd [#allocation3], 4294966272 }
  0x3a   :  { %1565 = dma.done.wait [#allocation6], 16384  }
  0x3b   :  { %1566 = vsyncadd [#allocation6], 4294950912  ;;  %v1325_v0 = vld [vmem:[#allocation5 + $0x4] ss:$12 sps:$4 sm:$0xff]   ;;  %v1327_v1 = vld [vmem:[#allocation5] ss:$12 sps:$4 sm:$0xff]  }
  0x3c   :  { %735 = vmatprep.subr.bf16.mxu0 %v1325_v0  ;;  %v1328_v2 = vld [vmem:[#allocation5 + $0x1c] ss:$12 sps:$4 sm:$0xff]   ;;  %v1330_v3 = vld [vmem:[#allocation5 + $0x18] ss:$12 sps:$4 sm:$0xff]   ;;  %v1331_v4 = vld [vmem:[#allocation5 + $0x34] ss:$12 sps:$4 sm:$0xff]  }
  0x3d   :  { %736 = vmatpush1.bf16.msra.mxu0 %v1327_v1  ;;  %v1333_v5 = vld [vmem:[#allocation5 + $0x30] ss:$12 sps:$4 sm:$0xff]   ;;  %v1334_v6 = vld [vmem:[#allocation5 + $0x4c] ss:$12 sps:$4 sm:$0xff]   ;;  %v1336_v7 = vld [vmem:[#allocation5 + $0x48] ss:$12 sps:$4 sm:$0xff]  }
  0x3e   :  { %737 = vmatprep.subr.bf16.mxu0 %v1328_v2  ;;  %v1337_v8 = vld [vmem:[#allocation5 + $0x64] ss:$12 sps:$4 sm:$0xff]   ;;  %v1349_v9 = vld [vmem:[#allocation5 + $0xc8] ss:$12 sps:$4 sm:$0xff]   ;;  %v1339_v11 = vld [vmem:[#allocation5 + $0x60] ss:$12 sps:$4 sm:$0xff]  }
  0x3f   :  { %v1350_v10 = vld [vmem:[#allocation5 + $0x8] ss:$12 sps:$4 sm:$0xff]   ;;  %1190 = vmatprep.subr.bf16.mxu1 %v1349_v9  ;;  %v1354_v12 = vld [vmem:[#allocation5 + $0xe0] ss:$12 sps:$4 sm:$0xff]   ;;  %v1342_v15 = vld [vmem:[#allocation5 + $0x78] ss:$12 sps:$4 sm:$0xff]  }
  0x40   :  { %1191 = vmatpush3.bf16.msra.mxu1 %v1350_v10  ;;  %v1355_v13 = vld [vmem:[#allocation5 + $0x20] ss:$12 sps:$4 sm:$0xff]   ;;  %v1340_v14 = vld [vmem:[#allocation5 + $0x7c] ss:$12 sps:$4 sm:$0xff]   ;;  %v1359_v16 = vld [vmem:[#allocation5 + $0xf8] ss:$12 sps:$4 sm:$0xff]  }
  0x41   :  { %738 = vmatpush1.bf16.msra.mxu0 %v1330_v3  ;;  %1192 = vmatprep.subr.bf16.mxu1 %v1354_v12  ;;  %v1360_v17 = vld [vmem:[#allocation5 + $0x38] ss:$12 sps:$4 sm:$0xff]   ;;  %v1343_v18 = vld [vmem:[#allocation5 + $0x94] ss:$12 sps:$4 sm:$0xff]   ;;  %v1364_v19 = vld [vmem:[#allocation5 + $0x110] ss:$12 sps:$4 sm:$0xff]  }
  0x42   :  { %739 = vmatprep.subr.bf16.mxu0 %v1331_v4  ;;  %v1365_v20 = vld [vmem:[#allocation5 + $0x50] ss:$12 sps:$4 sm:$0xff]   ;;  %v1346_v22 = vld [vmem:[#allocation5 + $0xac] ss:$12 sps:$4 sm:$0xff]   ;;  %v1369_v23 = vld [vmem:[#allocation5 + $0x128] ss:$12 sps:$4 sm:$0xff]  }
  0x43   :  { %v1345_v21 = vld [vmem:[#allocation5 + $0x90] ss:$12 sps:$4 sm:$0xff]   ;;  %v1348_v24 = vld [vmem:[#allocation5 + $0xa8] ss:$12 sps:$4 sm:$0xff]   ;;  %v1374_v27 = vld [vmem:[#allocation5 + $0x140] ss:$12 sps:$4 sm:$0xff]  }
  0x44   :  { %1193 = vmatpush3.bf16.msra.mxu1 %v1355_v13  ;;  %v1370_v25 = vld [vmem:[#allocation5 + $0x68] ss:$12 sps:$4 sm:$0xff]   ;;  %v1351_v26 = vld [vmem:[#allocation5 + $0xc4] ss:$12 sps:$4 sm:$0xff]   ;;  %v1353_v28 = vld [vmem:[#allocation5 + $0xc0] ss:$12 sps:$4 sm:$0xff]  }
  0x45   :  { %740 = vmatpush1.bf16.msra.mxu0 %v1333_v5  ;;  %1194 = vmatprep.subr.bf16.mxu1 %v1359_v16  ;;  %v1375_v29 = vld [vmem:[#allocation5 + $0x80] ss:$12 sps:$4 sm:$0xff]   ;;  %v1379_v30 = vld [vmem:[#allocation5 + $0x158] ss:$12 sps:$4 sm:$0xff]   ;;  %v1356_v31 = vld [vmem:[#allocation5 + $0xdc] ss:$12 sps:$4 sm:$0xff]  }
  0x46   :  { %741 = vmatprep.subr.bf16.mxu0 %v1334_v6  ;;  %v1358_v32 = vld [vmem:[#allocation5 + $0xd8] ss:$12 sps:$4 sm:$0xff]   ;;  %v1384_v34 = vld [vmem:[#allocation5 + $0x170] ss:$12 sps:$4 sm:$0xff]   ;;  %v1361_v35 = vld [vmem:[#allocation5 + $0xf4] ss:$12 sps:$4 sm:$0xff]  }
  0x47   :  { %v1380_v33 = vld [vmem:[#allocation5 + $0x98] ss:$12 sps:$4 sm:$0xff]   ;;  %v1363_v36 = vld [vmem:[#allocation5 + $0xf0] ss:$12 sps:$4 sm:$0xff]   ;;  %v67_v38 = vld [vmem:[#allocation2 + $0x8] sm:$0xff] }
  0x48   :  { %1195 = vmatpush3.bf16.msra.mxu1 %v1360_v17  ;;  %v1385_v37 = vld [vmem:[#allocation5 + $0xb0] ss:$12 sps:$4 sm:$0xff]   ;;  %v71_v39 = vld [vmem:[#allocation2 + $0x28] sm:$0xff]  ;;  %v66_v42 = vld [vmem:[#allocation2] sm:$0xff] }
  0x49   :  { %742 = vmatpush1.bf16.msra.mxu0 %v1336_v7  ;;  %1196 = vmatprep.subr.bf16.mxu1 %v1364_v19  ;;  %v75_v40 = vpack.c.bf16 %v71_v39, %v67_v38  ;;  %v1389_v41 = vld [vmem:[#allocation5 + $0x248] ss:$12 sps:$4 sm:$0xff]   ;;  %v70_v43 = vld [vmem:[#allocation2 + $0x20] sm:$0xff]  ;;  %v1366_v44 = vld [vmem:[#allocation5 + $0x10c] ss:$12 sps:$4 sm:$0xff]  }
  0x4a   :  { %743 = vmatprep.subr.bf16.mxu0 %v1337_v8  ;;  %v1368_v45 = vld [vmem:[#allocation5 + $0x108] ss:$12 sps:$4 sm:$0xff]   ;;  %v74_v46 = vpack.c.bf16 %v70_v43, %v66_v42  ;;  %v1394_v48 = vld [vmem:[#allocation5 + $0x260] ss:$12 sps:$4 sm:$0xff]   ;;  %v1371_v49 = vld [vmem:[#allocation5 + $0x124] ss:$12 sps:$4 sm:$0xff]  }
  0x4b   :  { %853 = vmatprep.mubr.bf16.mxu1 %v75_v40  ;;  %767 = vmatprep.mubr.bf16.mxu0 %v75_v40  ;;  %v1390_v47 = vld [vmem:[#allocation5 + $0x188] ss:$12 sps:$4 sm:$0xff]   ;;  %v1373_v50 = vld [vmem:[#allocation5 + $0x120] ss:$12 sps:$4 sm:$0xff]   ;;  %v1399_v52 = vld [vmem:[#allocation5 + $0x278] ss:$12 sps:$4 sm:$0xff]  }
  0x4c   :  { %1197 = vmatpush3.bf16.msra.mxu1 %v1365_v20  ;;  %v1395_v51 = vld [vmem:[#allocation5 + $0x1a0] ss:$12 sps:$4 sm:$0xff]   ;;  %v1376_v53 = vld [vmem:[#allocation5 + $0x13c] ss:$12 sps:$4 sm:$0xff]   ;;  %v1400_v54 = vld [vmem:[#allocation5 + $0x1b8] ss:$12 sps:$4 sm:$0xff]  }
  0x4d   :  { %744 = vmatpush1.bf16.msra.mxu0 %v1339_v11  ;;  %1198 = vmatprep.subr.bf16.mxu1 %v1369_v23  ;;  %v1378_v55 = vld [vmem:[#allocation5 + $0x138] ss:$12 sps:$4 sm:$0xff]   ;;  %v1404_v56 = vld [vmem:[#allocation5 + $0x290] ss:$12 sps:$4 sm:$0xff]   ;;  %v1381_v57 = vld [vmem:[#allocation5 + $0x154] ss:$12 sps:$4 sm:$0xff]  }
  0x4e   :  { %745 = vmatprep.subr.bf16.mxu0 %v1340_v14  ;;  %v1383_v58 = vld [vmem:[#allocation5 + $0x150] ss:$12 sps:$4 sm:$0xff]   ;;  %v1409_v60 = vld [vmem:[#allocation5 + $0x2a8] ss:$12 sps:$4 sm:$0xff]   ;;  %v1386_v61 = vld [vmem:[#allocation5 + $0x16c] ss:$12 sps:$4 sm:$0xff]  }
  0x4f   :  { %v1405_v59 = vld [vmem:[#allocation5 + $0x1d0] ss:$12 sps:$4 sm:$0xff]   ;;  %v1388_v62 = vld [vmem:[#allocation5 + $0x168] ss:$12 sps:$4 sm:$0xff]   ;;  %v1414_v0 = vld [vmem:[#allocation5 + $0x2c0] ss:$12 sps:$4 sm:$0xff]  }
  0x50   :  { %1199 = vmatpush3.bf16.msra.mxu1 %v1370_v25  ;;  %v1410_v63 = vld [vmem:[#allocation5 + $0x1e8] ss:$12 sps:$4 sm:$0xff]   ;;  %v1393_v1 = vld [vmem:[#allocation5 + $0x184] ss:$12 sps:$4 sm:$0xff]   ;;  %v1391_v2 = vld [vmem:[#allocation5 + $0x180] ss:$12 sps:$4 sm:$0xff]  }
  0x51   :  { %746 = vmatpush1.bf16.msra.mxu0 %v1342_v15  ;;  %1200 = vmatprep.subr.bf16.mxu1 %v1374_v27  ;;  %v1415_v3 = vld [vmem:[#allocation5 + $0x200] ss:$12 sps:$4 sm:$0xff]   ;;  %v1419_v4 = vld [vmem:[#allocation5 + $0x2d8] ss:$12 sps:$4 sm:$0xff]   ;;  %v1398_v5 = vld [vmem:[#allocation5 + $0x19c] ss:$12 sps:$4 sm:$0xff]  }
  0x52   :  { %747 = vmatprep.subr.bf16.mxu0 %v1343_v18  ;;  %v69_v6 = vld [vmem:[#allocation2 + $0x18] sm:$0xff]  ;;  %v1403_v12 = vld [vmem:[#allocation5 + $0x1b4] ss:$12 sps:$4 sm:$0xff]   ;;  %v1413_v20 = vld [vmem:[#allocation5 + $0x1e4] ss:$12 sps:$4 sm:$0xff]  }
  0x53   :  { %v73_v7 = vld [vmem:[#allocation2 + $0x38] sm:$0xff]  ;;  %v68_v14 = vld [vmem:[#allocation2 + $0x10] sm:$0xff] }
  0x54   :  { %1201 = vmatpush3.bf16.msra.mxu1 %v1375_v29  ;;  %v1420_v8 = vld [vmem:[#allocation5 + $0x218] ss:$12 sps:$4 sm:$0xff]   ;;  %v77_v9 = vpack.c.bf16 %v73_v7, %v69_v6  ;;  %v1424_v11 = vld [vmem:[#allocation5 + $0x2f0] ss:$12 sps:$4 sm:$0xff]   ;;  %v1406_v19 = vld [vmem:[#allocation5 + $0x1c8] ss:$12 sps:$4 sm:$0xff]  }
  0x55   :  { %748 = vmatpush1.bf16.msra.mxu0 %v1345_v21  ;;  %1202 = vmatprep.subr.bf16.mxu1 %v1379_v30  ;;  %v1396_v10 = vld [vmem:[#allocation5 + $0x198] ss:$12 sps:$4 sm:$0xff]   ;;  %v1425_v13 = vld [vmem:[#allocation5 + $0x230] ss:$12 sps:$4 sm:$0xff]   ;;  %v1411_v21 = vld [vmem:[#allocation5 + $0x1e0] ss:$12 sps:$4 sm:$0xff]  }
  0x56   :  { %749 = vmatprep.subr.bf16.mxu0 %v1346_v22  ;;  %v72_v15 = vld [vmem:[#allocation2 + $0x30] sm:$0xff]  ;;  %v1408_v17 = vld [vmem:[#allocation5 + $0x1cc] ss:$12 sps:$4 sm:$0xff]   ;;  %v1418_v22 = vld [vmem:[#allocation5 + $0x1fc] ss:$12 sps:$4 sm:$0xff]  }
  0x57   :  { %v1401_v16 = vld [vmem:[#allocation5 + $0x1b0] ss:$12 sps:$4 sm:$0xff]   ;;  %v76_v18 = vpack.c.bf16 %v72_v15, %v68_v14  ;;  %v1416_v23 = vld [vmem:[#allocation5 + $0x1f8] ss:$12 sps:$4 sm:$0xff]   ;;  %v1426_v27 = vld [vmem:[#allocation5 + $0x228] ss:$12 sps:$4 sm:$0xff]  }
  0x58   :  { %1203 = vmatpush3.bf16.msra.mxu1 %v1380_v33  ;;  %v1421_v25 = vld [vmem:[#allocation5 + $0x210] ss:$12 sps:$4 sm:$0xff]   ;;  %v1429_v29 = vld [vmem:[#allocation5 + $0x240] ss:$12 sps:$4 sm:$0xff]   ;;  %v1444_v39 = vld [vmem:[#allocation5 + $0x2b8] ss:$12 sps:$4 sm:$0xff]  }
  0x59   :  { %750 = vmatpush1.bf16.msra.mxu0 %v1348_v24  ;;  %1204 = vmatprep.subr.bf16.mxu1 %v1384_v34  ;;  %v1423_v24 = vld [vmem:[#allocation5 + $0x214] ss:$12 sps:$4 sm:$0xff]   ;;  %v1434_v30 = vld [vmem:[#allocation5 + $0x25c] ss:$12 sps:$4 sm:$0xff]   ;;  %v1440_v34 = vld [vmem:[#allocation5 + $0x28c] ss:$12 sps:$4 sm:$0xff]  }
  0x5a   :  { %751 = vmatprep.subr.bf16.mxu0 %v1351_v26  ;;  %v1428_v26 = vld [vmem:[#allocation5 + $0x22c] ss:$12 sps:$4 sm:$0xff]   ;;  %v1435_v33 = vld [vmem:[#allocation5 + $0x270] ss:$12 sps:$4 sm:$0xff]   ;;  %v1449_v40 = vld [vmem:[#allocation5 + $0x2d4] ss:$12 sps:$4 sm:$0xff]  }
  0x5b   :  { %v1446_v38 = vld [vmem:[#allocation5 + $0x2bc] ss:$12 sps:$4 sm:$0xff]   ;;  %v1452_v42 = vld [vmem:[#allocation5 + $0x2ec] ss:$12 sps:$4 sm:$0xff]   ;;  %v925_v7 = vld [vmem:[#allocation7 + $0x40] sm:$0xff] }
  0x5c   :  { %1205 = vmatpush3.bf16.msra.mxu1 %v1385_v37  ;;  %v1441_v37 = vld [vmem:[#allocation5 + $0x2a0] ss:$12 sps:$4 sm:$0xff]   ;;  %v1450_v43 = vld [vmem:[#allocation5 + $0x2e8] ss:$12 sps:$4 sm:$0xff]   ;;  %v928_v14 = vld [vmem:[#allocation7 + $0x58] sm:$0xff] }
  0x5d   :  { %752 = vmatpush1.bf16.msra.mxu0 %v1353_v28  ;;  %1212 = vmatprep.subr.bf16.mxu1 %v1389_v41  ;;  %v1431_v28 = vld [vmem:[#allocation5 + $0x244] ss:$12 sps:$4 sm:$0xff]  }
  0x5e   :  { %753 = vmatprep.subr.bf16.mxu0 %v1356_v31  ;;  %v1432_v31 = vld [vmem:[#allocation5 + $0x258] ss:$12 sps:$4 sm:$0xff]   ;;  %v1447_v41 = vld [vmem:[#allocation5 + $0x2d0] ss:$12 sps:$4 sm:$0xff]  }
  0x5f   :  { %854 = vmatmul.mubr.bf16.vlgmr.msra.gmra.mrb[0].mxu1 %v74_v46  ;;  %v945_v15 = vld [vmem:[#allocation7 + $0xe0] sm:$0xff] }
  0x60   :  { %1213 = vmatpush3.bf16.msra.mxu1 %v1390_v47  ;;  %894 = vmatprep.mubr.bf16.mxu1 %v77_v9 }
  0x61   :  { %754 = vmatpush1.bf16.msra.mxu0 %v1358_v32  ;;  %1214 = vmatprep.subr.bf16.mxu1 %v1394_v48  ;;  %v1437_v32 = vld [vmem:[#allocation5 + $0x274] ss:$12 sps:$4 sm:$0xff]   ;;  %v918_v48 = vld [vmem:[#allocation7 + $0x8] sm:$0xff] }
  0x62   :  { %755 = vmatprep.subr.bf16.mxu0 %v1361_v35  ;;  %v1438_v35 = vld [vmem:[#allocation5 + $0x288] ss:$12 sps:$4 sm:$0xff]  }
  0x64   :  { %1215 = vmatpush3.bf16.msra.mxu1 %v1395_v51 }
  0x65   :  { %756 = vmatpush1.bf16.msra.mxu0 %v1363_v36  ;;  %1216 = vmatprep.subr.bf16.mxu1 %v1399_v52  ;;  %v1443_v36 = vld [vmem:[#allocation5 + $0x2a4] ss:$12 sps:$4 sm:$0xff]  }
  0x66   :  { %757 = vmatprep.subr.bf16.mxu0 %v1366_v44  ;;  %v933_v44 = vld [vmem:[#allocation7 + $0x80] sm:$0xff] }
  0x68   :  { %1217 = vmatpush3.bf16.msra.mxu1 %v1400_v54  ;;  %v920_v54 = vld [vmem:[#allocation7 + $0x18] sm:$0xff] }
  0x69   :  { %758 = vmatpush1.bf16.msra.mxu0 %v1368_v45  ;;  %1218 = vmatprep.subr.bf16.mxu1 %v1404_v56  ;;  %v934_v45 = vld [vmem:[#allocation7 + $0x88] sm:$0xff] }
  0x6a   :  { %759 = vmatprep.subr.bf16.mxu0 %v1371_v49  ;;  %v1272_v47 = vpack.c.bf16 %v934_v45, %v933_v44  ;;  %v935_v49 = vld [vmem:[#allocation7 + $0x90] sm:$0xff]  ;;  %v938_v56 = vld [vmem:[#allocation7 + $0xa8] sm:$0xff] }
  0x6c   :  { %1219 = vmatpush3.bf16.msra.mxu1 %v1405_v59  ;;  %v921_v59 = vld [vmem:[#allocation7 + $0x20] sm:$0xff] }
  0x6d   :  { %760 = vmatpush1.bf16.msra.mxu0 %v1373_v50  ;;  %1220 = vmatprep.subr.bf16.mxu1 %v1409_v60  ;;  %v936_v50 = vld [vmem:[#allocation7 + $0x98] sm:$0xff]  ;;  %v922_v60 = vld [vmem:[#allocation7 + $0x28] sm:$0xff] }
  0x6e   :  { %761 = vmatprep.subr.bf16.mxu0 %v1376_v53  ;;  %v1276_v52 = vpack.c.bf16 %v936_v50, %v935_v49  ;;  %v919_v53 = vld [vmem:[#allocation7 + $0x10] sm:$0xff] }
  0x70   :  { %1221 = vmatpush3.bf16.msra.mxu1 %v1410_v63  ;;  %v1282_v63 = vpack.c.bf16 %v922_v60, %v921_v59 }
  0x71   :  { %762 = vmatpush1.bf16.msra.mxu0 %v1378_v55  ;;  %1222 = vmatprep.subr.bf16.mxu1 %v1414_v0  ;;  %v937_v55 = vld [vmem:[#allocation7 + $0xa0] sm:$0xff] }
  0x72   :  { %763 = vmatprep.subr.bf16.mxu0 %v1381_v57  ;;  %v1278_v57 = vpack.c.bf16 %v920_v54, %v919_v53 }
  0x74   :  { %1223 = vmatpush3.bf16.msra.mxu1 %v1415_v3  ;;  %v941_v3 = vld [vmem:[#allocation7 + $0xc0] sm:$0xff] }
  0x75   :  { %764 = vmatpush1.bf16.msra.mxu0 %v1383_v58  ;;  %1224 = vmatprep.subr.bf16.mxu1 %v1419_v4  ;;  %v1280_v58 = vpack.c.bf16 %v938_v56, %v937_v55  ;;  %v942_v4 = vld [vmem:[#allocation7 + $0xc8] sm:$0xff] }
  0x76   :  { %765 = vmatprep.subr.bf16.mxu0 %v1386_v61  ;;  %v939_v61 = vld [vmem:[#allocation7 + $0xb0] sm:$0xff]  ;;  %v1288_v6 = vpack.c.bf16 %v942_v4, %v941_v3 }
  0x78   :  { %1225 = vmatpush3.bf16.msra.mxu1 %v1420_v8  ;;  %v926_v8 = vld [vmem:[#allocation7 + $0x48] sm:$0xff] }
  0x79   :  { %766 = vmatpush1.bf16.msra.mxu0 %v1388_v62  ;;  %1226 = vmatprep.subr.bf16.mxu1 %v1424_v11  ;;  %v940_v62 = vld [vmem:[#allocation7 + $0xb8] sm:$0xff]  ;;  %v1290_v11 = vpack.c.bf16 %v926_v8, %v925_v7 }
  0x7a   :  { %778 = vmatprep.subr.bf16.mxu0 %v1393_v1  ;;  %v1284_v0 = vpack.c.bf16 %v940_v62, %v939_v61  ;;  %v923_v1 = vld [vmem:[#allocation7 + $0x30] sm:$0xff] }
  0x7c   :  { %768 = vmatmul.mubr.bf16.vlgmr.msra.gmra.mrb[0].mxu0 %v74_v46  ;;  %1227 = vmatpush3.bf16.msra.mxu1 %v1425_v13  ;;  %v917_v46 = vld [vmem:[#allocation7] sm:$0xff]  ;;  %v927_v13 = vld [vmem:[#allocation7 + $0x50] sm:$0xff] }
  0x7d   :  { %779 = vmatpush1.bf16.msra.mxu0 %v1391_v2  ;;  %810 = vmatprep.mubr.bf16.mxu0 %v77_v9  ;;  %v1274_v51 = vpack.c.bf16 %v918_v48, %v917_v46  ;;  %v924_v2 = vld [vmem:[#allocation7 + $0x38] sm:$0xff]  ;;  %v943_v9 = vld [vmem:[#allocation7 + $0xd0] sm:$0xff] }
  0x7e   :  { %780 = vmatprep.subr.bf16.mxu0 %v1398_v5  ;;  %1273 = vmatprep.subr.bf16.mxu1 %v1272_v47  ;;  %v1286_v5 = vpack.c.bf16 %v924_v2, %v923_v1 }
  0x7f   :  { %895 = vmatmul.mubr.bf16.vlgmr.msra.gmra.mrb[4].mxu1 %v76_v18 }
  0x80   :  { %1275 = vmatpush3.bf16.msra.mxu1 %v1274_v51 }
  0x81   :  { %781 = vmatpush1.bf16.msra.mxu0 %v1396_v10  ;;  %1277 = vmatprep.subr.bf16.mxu1 %v1276_v52  ;;  %v944_v10 = vld [vmem:[#allocation7 + $0xd8] sm:$0xff] }
  0x82   :  { %782 = vmatprep.subr.bf16.mxu0 %v1403_v12  ;;  %v1292_v12 = vpack.c.bf16 %v944_v10, %v943_v9 }
  0x84   :  { %1279 = vmatpush3.bf16.msra.mxu1 %v1278_v57 }
  0x85   :  { %783 = vmatpush1.bf16.msra.mxu0 %v1401_v16  ;;  %1281 = vmatprep.subr.bf16.mxu1 %v1280_v58  ;;  %v946_v16 = vld [vmem:[#allocation7 + $0xe8] sm:$0xff] }
  0x86   :  { %784 = vmatprep.subr.bf16.mxu0 %v1408_v17  ;;  %v1294_v17 = vpack.c.bf16 %v928_v14, %v927_v13 }
  0x88   :  { %1283 = vmatpush3.bf16.msra.mxu1 %v1282_v63 }
  0x89   :  { %785 = vmatpush1.bf16.msra.mxu0 %v1406_v19  ;;  %1285 = vmatprep.subr.bf16.mxu1 %v1284_v0  ;;  %v929_v19 = vld [vmem:[#allocation7 + $0x60] sm:$0xff] }
  0x8a   :  { %786 = vmatprep.subr.bf16.mxu0 %v1413_v20  ;;  %v930_v20 = vld [vmem:[#allocation7 + $0x68] sm:$0xff] }
  0x8c   :  { %1287 = vmatpush3.bf16.msra.mxu1 %v1286_v5 }
  0x8d   :  { %787 = vmatpush1.bf16.msra.mxu0 %v1411_v21  ;;  %1289 = vmatprep.subr.bf16.mxu1 %v1288_v6  ;;  %v1298_v21 = vpack.c.bf16 %v930_v20, %v929_v19  ;;  %v1173_v6 = vld [vmem:[%s1689_s4] ss:$0 sm:$0xff] }
  0x8e   :  { %788 = vmatprep.subr.bf16.mxu0 %v1418_v22  ;;  %v947_v22 = vld [vmem:[#allocation7 + $0xf0] sm:$0xff] }
  0x90   :  { %1291 = vmatpush3.bf16.msra.mxu1 %v1290_v11 }
  0x91   :  { %789 = vmatpush1.bf16.msra.mxu0 %v1416_v23  ;;  %1293 = vmatprep.subr.bf16.mxu1 %v1292_v12  ;;  %v948_v23 = vld [vmem:[#allocation7 + $0xf8] sm:$0xff] }
  0x92   :  { %790 = vmatprep.subr.bf16.mxu0 %v1423_v24  ;;  %v1300_v24 = vpack.c.bf16 %v948_v23, %v947_v22 }
  0x94   :  { %1295 = vmatpush3.bf16.msra.mxu1 %v1294_v17 }
  0x95   :  { %791 = vmatpush1.bf16.msra.mxu0 %v1421_v25  ;;  %v931_v25 = vld [vmem:[#allocation7 + $0x70] sm:$0xff] }
  0x96   :  { %792 = vmatprep.subr.bf16.mxu0 %v1428_v26  ;;  %v932_v26 = vld [vmem:[#allocation7 + $0x78] sm:$0xff] }
  0x99   :  { %793 = vmatpush1.bf16.msra.mxu0 %v1426_v27  ;;  %v1302_v27 = vpack.c.bf16 %v932_v26, %v931_v25 }
  0x9a   :  { %794 = vmatprep.subr.bf16.mxu0 %v1431_v28 }
  0x9d   :  { %795 = vmatpush1.bf16.msra.mxu0 %v1429_v29 }
  0x9e   :  { %796 = vmatprep.subr.bf16.mxu0 %v1434_v30 }
  0xa1   :  { %797 = vmatpush1.bf16.msra.mxu0 %v1432_v31 }
  0xa2   :  { %798 = vmatprep.subr.bf16.mxu0 %v1437_v32 }
  0xa5   :  { %799 = vmatpush1.bf16.msra.mxu0 %v1435_v33 }
  0xa6   :  { %800 = vmatprep.subr.bf16.mxu0 %v1440_v34  ;;  %v208_v34 = vlaneseq }
  0xa9   :  { %801 = vmatpush1.bf16.msra.mxu0 %v1438_v35  ;;  %v209_v35 = vshrl.u32 %v208_v34, 7 }
  0xaa   :  { %802 = vmatprep.subr.bf16.mxu0 %v1443_v36 }
  0xab   :  { %v218_v36 = vsub.s32 2, %v209_v35  ;;  %v214_v50 = vsub.s32 1, %v209_v35  ;;  %v210_v51 = vsub.s32 0, %v209_v35 }
  0xad   :  { %803 = vmatpush1.bf16.msra.mxu0 %v1441_v37  ;;  %v206_v37 = vld [vmem:[%s1687_s2] sm:$0x7] }
  0xae   :  { %804 = vmatprep.subr.bf16.mxu0 %v1446_v38  ;;  %v219_v38 = vrot.slane %v206_v37, %v218_v36  ;;  %v215_v52 = vrot.slane %v206_v37, %v214_v50  ;;  %v211_v53 = vrot.slane %v206_v37, %v210_v51 }
  0xb1   :  { %805 = vmatpush1.bf16.msra.mxu0 %v1444_v39 }
  0xb2   :  { %806 = vmatprep.subr.bf16.mxu0 %v1449_v40 }
  0xb5   :  { %807 = vmatpush1.bf16.msra.mxu0 %v1447_v41 }
  0xb6   :  { %808 = vmatprep.subr.bf16.mxu0 %v1452_v42 }
  0xb9   :  { %809 = vmatpush1.bf16.msra.mxu0 %v1450_v43 }
  0xbc   :  { %811 = vmatmul.mubr.bf16.vlgmr.msra.gmra.mrb[0].mxu0 %v76_v18  ;;  %v1296_v18 = vpack.c.bf16 %v946_v16, %v945_v15 }
  0xbe   :  { %1297 = vmatprep.subr.bf16.mxu1 %v1296_v18 }
  0xbf   :  { %1299 = vmatpush3.bf16.msra.mxu1 %v1298_v21 }
  0xc0   :  { %1301 = vmatprep.subr.bf16.mxu1 %v1300_v24 }
  0xc3   :  { %1303 = vmatpush3.bf16.msra.mxu1 %v1302_v27 }
 0x132   :  { %v1206_v28 = vpop.f32.mrb[0].mxu1 }
 0x133   :  { %v1207_v29 = vpop.f32.mrb[1].mxu1 }
 0x134   :  { %v1208_v30 = vadd.f32 %v1207_v29, %v1206_v28  ;;  %v1209_v31 = vpop.f32.mrb[2].mxu1 }
 0x135   :  { %v1210_v32 = vpop.f32.mrb[3].mxu1 }
 0x136   :  { %v1211_v33 = vadd.f32 %v1210_v32, %v1209_v31  ;;  %v856_v39 = vadd.f32 %v1208_v30, %v219_v38 }
 0x138   :  { %v859_v42 = vadd.f32 %v1211_v33, %v219_v38 }
 0x152   :  { %v1228_v40 = vpop.f32.mrb[4].mxu1 }
 0x153   :  { %v1229_v41 = vpop.f32.mrb[5].mxu1 }
 0x154   :  { %v1230_v43 = vadd.f32 %v1229_v41, %v1228_v40  ;;  %v1231_v44 = vpop.f32.mrb[6].mxu1 }
 0x155   :  { %v1232_v45 = vpop.f32.mrb[7].mxu1 }
 0x156   :  { %v897_v46 = vadd.f32 %v1230_v43, %v856_v39  ;;  %v1233_v47 = vadd.f32 %v1232_v45, %v1231_v44 }
 0x158   :  { %v914_v48 = vmax.f32 %v897_v46, 0.0  ;;  %v900_v49 = vadd.f32 %v1233_v47, %v859_v42 }
 0x15a   :  { %1020 = vmatprep.mubr.f32.mxu1 %v914_v48  ;;  %v916_v63 = vmax.f32 %v900_v49, 0.0 }
 0x18f   :  { %v812_v54 = vpop.f32.mrb[0].mxu0 }
 0x190   :  { %v814_v55 = vpop.f32.mrb[1].mxu0  ;;  %v1304_v58 = vadd.f32 %v812_v54, %v211_v53 }
 0x191   :  { %v1305_v56 = vadd.f32 %v814_v55, %v215_v52  ;;  %v816_v57 = vpop.f32.mrb[2].mxu0 }
 0x192   :  { %v1306_v59 = vadd.f32 %v816_v57, %v211_v53  ;;  %v818_v60 = vpop.f32.mrb[3].mxu0 }
 0x193   :  { %v913_v61 = vmax.f32 %v1305_v56, 0.0  ;;  %v1307_v62 = vadd.f32 %v818_v60, %v215_v52 }
 0x194   :  { %v1183_v0 = vpack.c.bf16 %v1306_v59, %v1304_v58 }
 0x195   :  { %1021 = vmatmul.mubr.f32.vlgmr.msra.gmra.mrb[8].mxu1 %v913_v61  ;;  %v915_v1 = vmax.f32 %v1307_v62, 0.0 }
 0x196   :  { %1184 = vst [vmem:[#allocation8] sm:$0xff] %v1183_v0   ;;  %1025 = vmatprep.mubr.f32.mxu1 %v916_v63 }
 0x199   :  { %1026 = vmatmul.mubr.f32.gmra.mrb[10].mxu1 %v915_v1 }
 0x268   :  { %v1266_v2 = vpop.f32.mrb[8].mxu1 }
 0x269   :  { %v1267_v3 = vpop.f32.mrb[9].mxu1 }
 0x26a   :  { %v1268_v4 = vadd.f32 %v1267_v3, %v1266_v2 }
 0x26c   :  { %v1269_v5 = vpop.f32.mrb[10].mxu1  ;;  %v1023_v9 = vadd.f32 %v1268_v4, %v1173_v6 }
 0x26d   :  { %v1270_v7 = vpop.f32.mrb[11].mxu1 }
 0x26e   :  { %v1271_v8 = vadd.f32 %v1270_v7, %v1269_v5 }
 0x270   :  { %v1028_v10 = vadd.f32 %v1271_v8, %v1173_v6 }
 0x272   :  { %v1188_v11 = vpack.c.bf16 %v1028_v10, %v1023_v9 }
 0x274   :  { %1189 = vst [vmem:[#allocation9] sm:$0xff] %v1188_v11  }
 0x275   :  { %1045 = vsyncadd [#allocation4], 64  ;;  %s1580_s16 = smov [#allocation8]  }
 0x276   :  { %s1046_s17 = sshll.u32 %s1580_s16, 4  ;;  %s1047_s17 = int_to_ptr.vmem [resolvable:$true] %s1046_s17 }
 0x277   :  { %s1519_s18 = scalar_lea.vmem %s1047_s17, 64  ;;  %s1523_s19 = scalar_lea.vmem %s1047_s17, 128 }
 0x278   :  { %p1520_p10 = scmp.ne.s32.totalorder %s1047_s17, %s1519_s18  ;;  %p1524_p11 = scmp.lt.s32.totalorder %s1047_s17, %s1047_s17 }
 0x279   :  { %p1525_p12 = scmp.lt.s32.totalorder %s1523_s19, %s1519_s18 }
 0x27b   :  { %p1526_p13 = por %p1525_p12, %p1524_p11 }
 0x27d   :  { %p1527_p0 = pnand %p1526_p13, %p1520_p10 }
 0x27f   :  { %1530 = shalt.err (!%p1527_p0)
}
 0x280   :  { %s1531_s1 = scalar_lea.hbm %s1690_s5, 64 }
 0x281   :  { %p1532_p1 = scmp.ne.s32.totalorder %s1690_s5, %s1531_s1  ;;  %p1535_p2 = scmp.lt.u32.totalorder %s1531_s1, %s1690_s5 }
 0x283   :  { %p1537_p3 = pnand %p1535_p2, %p1532_p1 }
 0x285   :  { %1540 = shalt.err (!%p1537_p3)
}
 0x286   :  { %s1581_s25 = smov 64   ;;  %s1582_s26 = smov 4  }
 0x287   :  { %1052 = dma.vmem_to_hbm [thread:$0]  %s1047_s17, 64, %s1690_s5, [#allocation4], %s1581_s25, %s1581_s25, %s1582_s26  }
 0x288   :  { %1057 = vsyncadd [#allocation10], 64  ;;  %s1583_s29 = smov [#allocation9]  }
 0x289   :  { %s1058_s30 = sshll.u32 %s1583_s29, 4  ;;  %s1059_s30 = int_to_ptr.vmem [resolvable:$true] %s1058_s30 }
 0x28a   :  { %s1541_s7 = scalar_lea.vmem %s1059_s30, 64  ;;  %s1545_s8 = scalar_lea.vmem %s1059_s30, 128 }
 0x28b   :  { %p1542_p4 = scmp.ne.s32.totalorder %s1059_s30, %s1541_s7  ;;  %p1546_p5 = scmp.lt.s32.totalorder %s1059_s30, %s1059_s30 }
 0x28c   :  { %p1547_p6 = scmp.lt.s32.totalorder %s1545_s8, %s1541_s7 }
 0x28e   :  { %p1548_p7 = por %p1547_p6, %p1546_p5 }
 0x290   :  { %p1549_p8 = pnand %p1548_p7, %p1542_p4 }
 0x292   :  { %1552 = shalt.err (!%p1549_p8)
}
 0x293   :  { %s1553_s0 = scalar_lea.hbm %s1691_s6, 64 }
 0x294   :  { %p1554_p9 = scmp.ne.s32.totalorder %s1691_s6, %s1553_s0  ;;  %p1557_p10 = scmp.lt.u32.totalorder %s1553_s0, %s1691_s6 }
 0x296   :  { %p1559_p11 = pnand %p1557_p10, %p1554_p9 }
 0x298   :  { %1562 = shalt.err (!%p1559_p11)
}
 0x299   :  { %1064 = dma.vmem_to_hbm [thread:$0]  %s1059_s30, 64, %s1691_s6, [#allocation10], %s1581_s25, %s1581_s25, %s1582_s26  }
 0x29a   :  { %1567 = dma.done.wait [#allocation4], 128  }
 0x29b   :  { %1568 = vsyncadd [#allocation4], 4294967168 }
 0x29c   :  { %1569 = dma.done.wait [#allocation10], 128  }
 0x29d   :  { %1570 = vsyncadd [#allocation10], 4294967168 }
 0x29e   :  { %1071 = vsyncpa [#allocation3], 1 }
 0x29f   :  { %1072 = vsyncpa [#allocation6], 1 }
 0x2a0   :  { %1073 = vsyncpa [#allocation4], 1 }
 0x2a1   :  { %1074 = vsyncpa [#allocation10], 1 }

</bundles_post_ra>
